<compile_context>
chip_gen: v6e
topology: v6e:2x2x1
jax: 0.10.0
libtpu: 0.0.40
codegen_flags: <defaults>
</compile_context>

<pallas_src>
import functools

import jax
import jax.numpy as jnp
from jax.experimental import pallas as pl
from jax.experimental.pallas import tpu as pltpu


def _round_up(n, m):
    return (n + m - 1) // m * m


def _cdiv(a, b):
    return -(-a // b)


def _vmem_budget():
    """Usable VMEM target per generation (bytes), with compiler headroom."""
    phys = 64 * 2 ** 20
    try:
        phys = int(pltpu.get_tpu_info().vmem_capacity_bytes)
    except Exception:
        pass
    if phys >= 96 * 2 ** 20:                  # v5e / v6e: 128 MiB physical
        return int(min(phys - 20 * 2 ** 20, 108 * 2 ** 20))
    return int((phys * 13) // 16)             # v7x: ~52 of 64 MiB per TC


def _pick_tm(rows, target):
    """Balanced row-tile size: ~target rows/tile; >=2 (even) tiles when rows>8
    so both v7x TensorCores get work; rounded up to the 8-row sublane multiple."""
    n_tiles = max(_cdiv(rows, target), 1)
    if rows > 8:
        n_tiles = max(n_tiles, 2)
        if n_tiles % 2:
            n_tiles += 1
    return _round_up(_cdiv(rows, n_tiles), 8)


def _layer_norm_f32(x_ref, gamma_ref, beta_ref, *, eps, d_model_true):
    """f32 LayerNorm over the (possibly lane-padded) last dim of the x tile."""
    x = x_ref[...].astype(jnp.float32)
    inv_d = 1.0 / d_model_true
    mean = jnp.sum(x, axis=-1, keepdims=True) * inv_d
    xc = x - mean
    if x.shape[-1] != d_model_true:
        # Zero-padded lanes must not pollute the variance.
        lane = jax.lax.broadcasted_iota(jnp.int32, x.shape, dimension=1)
        xc = jnp.where(lane < d_model_true, xc, 0.0)
    var = jnp.sum(xc * xc, axis=-1, keepdims=True) * inv_d
    inv = jax.lax.rsqrt(var + eps)
    return (xc * inv * gamma_ref[...].astype(jnp.float32)
            + beta_ref[...].astype(jnp.float32))


def _ffn_resident_kernel(x_ref, gamma_ref, beta_ref, w1_ref, b1_ref, w2_ref,
                         b2_ref, o_ref, *, eps, d_model_true):
    """Grid: (row tiles,) — full W1/W2 resident in VMEM, no scratch needed."""
    y = _layer_norm_f32(x_ref, gamma_ref, beta_ref,
                        eps=eps, d_model_true=d_model_true)
    y = y.astype(w1_ref.dtype)       # bf16 weights -> bf16 MXU path
    h = jnp.dot(y, w1_ref[...], preferred_element_type=jnp.float32)
    h = jnp.maximum(h + b1_ref[...].astype(jnp.float32), 0.0)
    out = jnp.dot(h.astype(w2_ref.dtype), w2_ref[...],
                  preferred_element_type=jnp.float32)
    o_ref[...] = (out + b2_ref[...].astype(jnp.float32)).astype(o_ref.dtype)


def _ffn_stream_kernel(x_ref, gamma_ref, beta_ref, w1_ref, b1_ref, w2_ref,
                       b2_ref, o_ref, y_scr, acc_scr, *, eps, d_model_true):
    """Grid: (row tiles ["parallel"], d_inner chunks ["arbitrary"])."""
    j = pl.program_id(1)

    # LayerNorm once per row tile.
    @pl.when(j == 0)
    def _():
        y = _layer_norm_f32(x_ref, gamma_ref, beta_ref,
                            eps=eps, d_model_true=d_model_true)
        y_scr[...] = y.astype(y_scr.dtype)

    # Linear(d_model -> ti chunk) + ReLU, f32 accumulation.
    h = jnp.dot(y_scr[...], w1_ref[...], preferred_element_type=jnp.float32)
    h = jnp.maximum(h + b1_ref[...].astype(jnp.float32), 0.0)

    # Linear(ti chunk -> d_model): assign first chunk, accumulate the rest
    # (avoids a separate zeroing pass over the f32 accumulator).
    part = jnp.dot(h.astype(w2_ref.dtype), w2_ref[...],
                   preferred_element_type=jnp.float32)

    @pl.when(j == 0)
    def _():
        acc_scr[...] = part

    @pl.when(j > 0)
    def _():
        acc_scr[...] += part

    @pl.when(j == pl.num_programs(1) - 1)
    def _():
        o_ref[...] = (acc_scr[...]
                      + b2_ref[...].astype(jnp.float32)).astype(o_ref.dtype)


def prepare_ffn_params(gamma, beta, w1, b1, w2, b2, *, compute_dtype=None):
    """One-time (parameter-load time) prep: transpose PyTorch (out, in) weights
    to (in, out); zero-pad d_model to a multiple of 128 and d_inner to a
    multiple of 256 (v6e/v7x MXU is 256 wide; zero padding keeps math exact);
    optionally cast W1/W2 to `compute_dtype` (e.g. jnp.bfloat16)."""
    d_inner, d_model = w1.shape
    dm_p = _round_up(d_model, 128)
    di_p = _round_up(d_inner, 256) if d_inner > 128 else 128
    wdt = compute_dtype if compute_dtype is not None else w1.dtype

    def pad2(a, r, c, dt=None):
        if dt is not None:
            a = a.astype(dt)
        return jnp.pad(a, ((0, r - a.shape[0]), (0, c - a.shape[1])))

    return dict(
        d_model=d_model,
        gamma=pad2(gamma.reshape(1, d_model), 1, dm_p),
        beta=pad2(beta.reshape(1, d_model), 1, dm_p),
        w1_t=pad2(w1.T, dm_p, di_p, wdt),               # (d_model_pad, d_inner_pad)
        b1=pad2(b1.reshape(1, d_inner), 1, di_p),
        w2_t=pad2(w2.T, di_p, dm_p, wdt),               # (d_inner_pad, d_model_pad)
        b2=pad2(b2.reshape(1, d_model), 1, dm_p),
    )


def feed_forward(x, params, *, eps=1e-5, force_stream=False):
    """x: (batch, seq, d_model) -> (batch, seq, d_model)."""
    batch, seq, d_model = x.shape
    assert d_model == params["d_model"]
    gamma, beta = params["gamma"], params["beta"]
    w1_t, b1 = params["w1_t"], params["b1"]
    w2_t, b2 = params["w2_t"], params["b2"]
    dm_p, di_p = w1_t.shape

    rows = batch * seq
    xb = x.dtype.itemsize
    wb = w1_t.dtype.itemsize
    budget = _vmem_budget()

    def act_bytes(tm_):              # x tile + out tile, double-buffered
        return 2 * tm_ * dm_p * xb * 2

    def inter_bytes(tm_, ti_):       # h (f32) + LayerNorm temps, rough estimate
        return tm_ * ti_ * 4 + 2 * tm_ * dm_p * 4

    small = 2 * (3 * dm_p + di_p) * 4     # gamma/beta/b2 + b1 (<= f32, 2 bufs)

    # ---------------- Path A: W1/W2 fully resident in VMEM ----------------
    resident, tm = False, None
    if not force_stream:
        for tm_try in (256, 128):
            tmr = _pick_tm(rows, tm_try)
            w_res = 2 * dm_p * di_p * wb            # W1 + W2, single-buffered
            fp = w_res + small + act_bytes(tmr) + inter_bytes(tmr, di_p)
            if fp <= budget:
                tm, resident = tmr, True
                break

    if not resident:
        # ------------- Path B: stream d_inner in ti-wide chunks -------------
        tm = _pick_tm(rows, 512)                    # more flops per streamed byte
        min_chunk = 2 * (2 * dm_p + 1) * 256 * wb   # smallest W1/W2/b1 chunk set
        while tm > 8 and (small + act_bytes(tm) + tm * dm_p * (wb + 4)
                          + min_chunk + tm * 256 * 4) > budget:
            tm = max(_round_up(tm // 2, 8), 8)
        fixed = small + act_bytes(tm) + tm * dm_p * (wb + 4)   # + y_scr + acc_scr
        # Largest multiple-of-256 divisor of di_p that fits (128 as last resort).
        cands = sorted({c for c in range(256, di_p, 256) if di_p % c == 0} | {128},
                       reverse=True)
        ti = 128
        for c in cands:
            per = 2 * (2 * dm_p + 1) * c * wb + tm * c * 4
            if fixed + per <= budget:
                ti = c
                break
        n_j = di_p // ti

    rows_p = _round_up(rows, tm)
    grid_rows = rows_p // tm

    x2 = x.reshape(rows, d_model)
    needs_pad = (rows_p != rows) or (dm_p != d_model)
    if needs_pad:
        x2 = jnp.pad(x2, ((0, rows_p - rows), (0, dm_p - d_model)))

    args = (x2, gamma, beta, w1_t, b1, w2_t, b2)
    out_shape = jax.ShapeDtypeStruct((rows_p, dm_p), x.dtype)

    if resident:
        kern = functools.partial(_ffn_resident_kernel, eps=eps, d_model_true=d_model)

        def build(single_buffer_weights):
            wmode = ({"pipeline_mode": pl.Buffered(1)}
                     if single_buffer_weights else {})
            return pl.pallas_call(
                kern,
                out_shape=out_shape,
                grid_spec=pltpu.PrefetchScalarGridSpec(
                    num_scalar_prefetch=0,
                    grid=(grid_rows,),
                    in_specs=[
                        pl.BlockSpec((tm, dm_p), lambda i: (i, 0)),            # x rows
                        pl.BlockSpec((1, dm_p), lambda i: (0, 0)),             # gamma
                        pl.BlockSpec((1, dm_p), lambda i: (0, 0)),             # beta
                        pl.BlockSpec((dm_p, di_p), lambda i: (0, 0), **wmode),  # W1^T
                        pl.BlockSpec((1, di_p), lambda i: (0, 0)),             # b1
                        pl.BlockSpec((di_p, dm_p), lambda i: (0, 0), **wmode),  # W2^T
                        pl.BlockSpec((1, dm_p), lambda i: (0, 0)),             # b2
                    ],
                    out_specs=pl.BlockSpec((tm, dm_p), lambda i: (i, 0)),
                ),
                compiler_params=pltpu.CompilerParams(
                    dimension_semantics=("parallel",),
                    vmem_limit_bytes=int(budget),
                ),
            )

        try:
            out2 = build(True)(*args)
        except Exception:
            # pipeline_mode=Buffered(1) unsupported -> default double-buffering.
            out2 = build(False)(*args)
    else:
        kern = functools.partial(_ffn_stream_kernel, eps=eps, d_model_true=d_model)
        out2 = pl.pallas_call(
            kern,
            out_shape=out_shape,
            grid_spec=pltpu.PrefetchScalarGridSpec(
                num_scalar_prefetch=0,
                grid=(grid_rows, n_j),
                in_specs=[
                    pl.BlockSpec((tm, dm_p), lambda i, j: (i, 0)),   # x rows
                    pl.BlockSpec((1, dm_p), lambda i, j: (0, 0)),    # gamma
                    pl.BlockSpec((1, dm_p), lambda i, j: (0, 0)),    # beta
                    pl.BlockSpec((dm_p, ti), lambda i, j: (0, j)),   # W1^T chunk
                    pl.BlockSpec((1, ti), lambda i, j: (0, j)),      # b1 chunk
                    pl.BlockSpec((ti, dm_p), lambda i, j: (j, 0)),   # W2^T chunk
                    pl.BlockSpec((1, dm_p), lambda i, j: (0, 0)),    # b2
                ],
                out_specs=pl.BlockSpec((tm, dm_p), lambda i, j: (i, 0)),
                scratch_shapes=[
                    pltpu.VMEM((tm, dm_p), w1_t.dtype),   # normalized activations y
                    pltpu.VMEM((tm, dm_p), jnp.float32),  # f32 output accumulator
                ],
            ),
            compiler_params=pltpu.CompilerParams(
                dimension_semantics=("parallel", "arbitrary"),
                vmem_limit_bytes=int(budget),
            ),
        )(*args)

    if needs_pad:
        out2 = out2[:rows, :d_model]
    return out2.reshape(batch, seq, d_model)


def _reference(x, gamma, beta, w1, b1, w2, b2, eps=1e-5):
    x = x.astype(jnp.float32)
    mean = jnp.mean(x, axis=-1, keepdims=True)
    var = jnp.mean((x - mean) ** 2, axis=-1, keepdims=True)
    y = (x - mean) / jnp.sqrt(var + eps) * gamma + beta
    h = jnp.maximum(y @ w1.T + b1, 0.0)
    return h @ w2.T + b2


if __name__ == "__main__":
    batch, seq, d_model, d_inner = 2, 8, 32, 64

    key = jax.random.PRNGKey(0)
    kx, kg, kb, kw1, kb1, kw2, kb2, kx2, kw3, kw4 = jax.random.split(key, 10)

    x = jax.random.normal(kx, (batch, seq, d_model), dtype=jnp.float32)

    # Deterministic synthetic parameters (shapes per nn.LayerNorm / nn.Linear).
    gamma = 1.0 + 0.1 * jax.random.normal(kg, (d_model,), dtype=jnp.float32)
    beta = 0.1 * jax.random.normal(kb, (d_model,), dtype=jnp.float32)
    w1 = jax.random.normal(kw1, (d_inner, d_model), dtype=jnp.float32) / d_model ** 0.5
    b1 = 0.01 * jax.random.normal(kb1, (d_inner,), dtype=jnp.float32)
    w2 = jax.random.normal(kw2, (d_model, d_inner), dtype=jnp.float32) / d_inner ** 0.5
    b2 = 0.01 * jax.random.normal(kb2, (d_model,), dtype=jnp.float32)

    # One-time parameter prep (transpose + lane padding) outside the hot path.
    params = prepare_ffn_params(gamma, beta, w1, b1, w2, b2)

    # 1) Resident-weight path (weights fit VMEM easily).
    out = jax.block_until_ready(feed_forward(x, params))
    ref = _reference(x, gamma, beta, w1, b1, w2, b2)
    assert out.shape == (batch, seq, d_model)
    assert jnp.allclose(out, ref, atol=1e-4, rtol=1e-4), "mismatch (resident path)"

    # 2) Row count not a multiple of 8 -> exercises row padding / balanced tiles.
    x_odd = jax.random.normal(kx2, (batch, 5, d_model), dtype=jnp.float32)
    out_odd = jax.block_until_ready(feed_forward(x_odd, params))
    ref_odd = _reference(x_odd, gamma, beta, w1, b1, w2, b2)
    assert jnp.allclose(out_odd, ref_odd, atol=1e-4, rtol=1e-4), "mismatch (padded rows)"

    # 3) Streaming (d_inner-chunked) path, forced at a small shape so the
    #    accumulate-across-chunks code is exercised (ti=256, n_j=2).
    d_inner2 = 512
    w1b = jax.random.normal(kw3, (d_inner2, d_model), dtype=jnp.float32) / d_model ** 0.5
    b1b = jnp.zeros((d_inner2,), jnp.float32)
    w2b = jax.random.normal(kw4, (d_model, d_inner2), dtype=jnp.float32) / d_inner2 ** 0.5
    params2 = prepare_ffn_params(gamma, beta, w1b, b1b, w2b, b2)
    out_s = jax.block_until_ready(feed_forward(x, params2, force_stream=True))
    ref_s = _reference(x, gamma, beta, w1b, b1b, w2b, b2)
    assert jnp.allclose(out_s, ref_s, atol=1e-4, rtol=1e-4), "mismatch (streaming path)"

    # 4) bf16 compute weights (v6e/v7x deployment mode) -- loose tolerance since
    #    y and h are quantized to bf16 before each MXU pass (accumulation is f32).
    params_bf16 = prepare_ffn_params(gamma, beta, w1, b1, w2, b2,
                                     compute_dtype=jnp.bfloat16)
    out_bf = jax.block_until_ready(feed_forward(x, params_bf16))
    assert jnp.allclose(out_bf, ref, atol=1e-1, rtol=5e-2), "mismatch (bf16 weights)"

    # TODO(synk): Dropout is identity here (inference semantics); training-mode
    # dropout would use pltpu.prng_seed + pltpu.stateful_bernoulli in-kernel.
    print("KERNEL_OK")
</pallas_src>

<mosaic_0001>
module attributes {stable_mosaic.version = 11 : i64} {
  func.func @_ffn_resident_kernel(%arg0: i32, %arg1: memref<8x128xf32, #tpu.memory_space<vmem>>, %arg2: memref<1x128xf32, #tpu.memory_space<vmem>>, %arg3: memref<1x128xf32, #tpu.memory_space<vmem>>, %arg4: memref<128x128xf32, #tpu.memory_space<vmem>>, %arg5: memref<1x128xf32, #tpu.memory_space<vmem>>, %arg6: memref<128x128xf32, #tpu.memory_space<vmem>>, %arg7: memref<1x128xf32, #tpu.memory_space<vmem>>, %arg8: memref<8x128xf32, #tpu.memory_space<vmem>>) attributes {dimension_semantics = [#tpu.dimension_semantics<parallel>], iteration_bounds = array<i64: 2>, scalar_prefetch = 0 : i64, scratch_operands = 0 : i64, tpu.core_type = #tpu.core_type<tc>, window_params = [{transform_indices = @transform_0, window_bounds = array<i64: 8, 128>}, {pipeline_mode = #tpu.pipeline_mode<synchronous>, transform_indices = @transform_1, window_bounds = array<i64: 1, 128>}, {pipeline_mode = #tpu.pipeline_mode<synchronous>, transform_indices = @transform_2, window_bounds = array<i64: 1, 128>}, {pipeline_mode = #tpu.pipeline_mode<synchronous>, transform_indices = @transform_3, window_bounds = array<i64: 128, 128>}, {pipeline_mode = #tpu.pipeline_mode<synchronous>, transform_indices = @transform_4, window_bounds = array<i64: 1, 128>}, {pipeline_mode = #tpu.pipeline_mode<synchronous>, transform_indices = @transform_5, window_bounds = array<i64: 128, 128>}, {pipeline_mode = #tpu.pipeline_mode<synchronous>, transform_indices = @transform_6, window_bounds = array<i64: 1, 128>}, {transform_indices = @transform_7, window_bounds = array<i64: 8, 128>}]} {
    %c0 = arith.constant 0 : index
    %c0_0 = arith.constant 0 : index
    %0 = vector.load %arg1[%c0, %c0_0] : memref<8x128xf32, #tpu.memory_space<vmem>>, vector<8x128xf32>
    %cst = arith.constant dense<0.000000e+00> : vector<8xf32>
    %1 = vector.multi_reduction <add>, %0, %cst [1] : vector<8x128xf32> to vector<8xf32>
    %2 = vector.shape_cast %1 : vector<8xf32> to vector<8x1xf32>
    %cst_1 = arith.constant 3.125000e-02 : f32
    %3 = vector.broadcast %cst_1 : f32 to vector<8x1xf32>
    %4 = arith.mulf %2, %3 : vector<8x1xf32>
    %5 = vector.broadcast %4 : vector<8x1xf32> to vector<8x128xf32>
    %6 = arith.subf %0, %5 : vector<8x128xf32>
    %7 = tpu.iota {dimensions = array<i32: 1>} : vector<8x128xi32>
    %c32_i32 = arith.constant 32 : i32
    %8 = vector.broadcast %c32_i32 : i32 to vector<8x128xi32>
    %9 = arith.cmpi slt, %7, %8 : vector<8x128xi32>
    %cst_2 = arith.constant 0.000000e+00 : f32
    %10 = vector.broadcast %cst_2 : f32 to vector<8x128xf32>
    %11 = arith.select %9, %6, %10 : vector<8x128xi1>, vector<8x128xf32>
    %12 = arith.mulf %11, %11 : vector<8x128xf32>
    %cst_3 = arith.constant dense<0.000000e+00> : vector<8xf32>
    %13 = vector.multi_reduction <add>, %12, %cst_3 [1] : vector<8x128xf32> to vector<8xf32>
    %14 = vector.shape_cast %13 : vector<8xf32> to vector<8x1xf32>
    %cst_4 = arith.constant 3.125000e-02 : f32
    %15 = vector.broadcast %cst_4 : f32 to vector<8x1xf32>
    %16 = arith.mulf %14, %15 : vector<8x1xf32>
    %cst_5 = arith.constant 9.99999974E-6 : f32
    %17 = vector.broadcast %cst_5 : f32 to vector<8x1xf32>
    %18 = arith.addf %16, %17 : vector<8x1xf32>
    %19 = math.rsqrt %18 : vector<8x1xf32>
    %20 = vector.broadcast %19 : vector<8x1xf32> to vector<8x128xf32>
    %21 = arith.mulf %11, %20 : vector<8x128xf32>
    %c0_6 = arith.constant 0 : index
    %c0_7 = arith.constant 0 : index
    %22 = vector.load %arg2[%c0_6, %c0_7] : memref<1x128xf32, #tpu.memory_space<vmem>>, vector<1x128xf32>
    %23 = vector.broadcast %22 : vector<1x128xf32> to vector<8x128xf32>
    %24 = arith.mulf %21, %23 : vector<8x128xf32>
    %c0_8 = arith.constant 0 : index
    %c0_9 = arith.constant 0 : index
    %25 = vector.load %arg3[%c0_8, %c0_9] : memref<1x128xf32, #tpu.memory_space<vmem>>, vector<1x128xf32>
    %26 = vector.broadcast %25 : vector<1x128xf32> to vector<8x128xf32>
    %27 = arith.addf %24, %26 : vector<8x128xf32>
    %c0_10 = arith.constant 0 : index
    %c0_11 = arith.constant 0 : index
    %28 = vector.load %arg4[%c0_10, %c0_11] : memref<128x128xf32, #tpu.memory_space<vmem>>, vector<128x128xf32>
    %cst_12 = arith.constant dense<0.000000e+00> : vector<8x128xf32>
    %29 = tpu.matmul %27, %28, %cst_12 {dimension_numbers = #tpu.dot_dimension_numbers<[1], [0], [0], [1], [0, 0, 1, 1], [], []>} : vector<8x128xf32>, vector<128x128xf32>, vector<8x128xf32> -> vector<8x128xf32>
    %c0_13 = arith.constant 0 : index
    %c0_14 = arith.constant 0 : index
    %30 = vector.load %arg5[%c0_13, %c0_14] : memref<1x128xf32, #tpu.memory_space<vmem>>, vector<1x128xf32>
    %31 = vector.broadcast %30 : vector<1x128xf32> to vector<8x128xf32>
    %32 = arith.addf %29, %31 : vector<8x128xf32>
    %cst_15 = arith.constant 0.000000e+00 : f32
    %33 = vector.broadcast %cst_15 : f32 to vector<8x128xf32>
    %34 = arith.maximumf %32, %33 : vector<8x128xf32>
    %c0_16 = arith.constant 0 : index
    %c0_17 = arith.constant 0 : index
    %35 = vector.load %arg6[%c0_16, %c0_17] : memref<128x128xf32, #tpu.memory_space<vmem>>, vector<128x128xf32>
    %cst_18 = arith.constant dense<0.000000e+00> : vector<8x128xf32>
    %36 = tpu.matmul %34, %35, %cst_18 {dimension_numbers = #tpu.dot_dimension_numbers<[1], [0], [0], [1], [0, 0, 1, 1], [], []>} : vector<8x128xf32>, vector<128x128xf32>, vector<8x128xf32> -> vector<8x128xf32>
    %c0_19 = arith.constant 0 : index
    %c0_20 = arith.constant 0 : index
    %37 = vector.load %arg7[%c0_19, %c0_20] : memref<1x128xf32, #tpu.memory_space<vmem>>, vector<1x128xf32>
    %38 = vector.broadcast %37 : vector<1x128xf32> to vector<8x128xf32>
    %39 = arith.addf %36, %38 : vector<8x128xf32>
    %c0_21 = arith.constant 0 : index
    %c0_22 = arith.constant 0 : index
    %40 = vector.load %arg8[%c0_21, %c0_22] : memref<8x128xf32, #tpu.memory_space<vmem>>, vector<8x128xf32>
    tpu.vector_store %arg8[%c0_21, %c0_22], %39 {strides = array<i32>} : memref<8x128xf32, #tpu.memory_space<vmem>>, vector<8x128xf32>,
    return
  }
  func.func @transform_0(%arg0: i32) -> (i32, i32) {
    %c0_i32 = arith.constant 0 : i32
    %c0_i32_0 = arith.constant 0 : i32
    return %arg0, %c0_i32 : i32, i32
  }
  func.func @transform_1(%arg0: i32) -> (i32, i32) {
    %c0_i32 = arith.constant 0 : i32
    %c0_i32_0 = arith.constant 0 : i32
    %c0_i32_1 = arith.constant 0 : i32
    return %c0_i32, %c0_i32_0 : i32, i32
  }
  func.func @transform_2(%arg0: i32) -> (i32, i32) {
    %c0_i32 = arith.constant 0 : i32
    %c0_i32_0 = arith.constant 0 : i32
    %c0_i32_1 = arith.constant 0 : i32
    return %c0_i32, %c0_i32_0 : i32, i32
  }
  func.func @transform_3(%arg0: i32) -> (i32, i32) {
    %c0_i32 = arith.constant 0 : i32
    %c0_i32_0 = arith.constant 0 : i32
    %c0_i32_1 = arith.constant 0 : i32
    return %c0_i32, %c0_i32_0 : i32, i32
  }
  func.func @transform_4(%arg0: i32) -> (i32, i32) {
    %c0_i32 = arith.constant 0 : i32
    %c0_i32_0 = arith.constant 0 : i32
    %c0_i32_1 = arith.constant 0 : i32
    return %c0_i32, %c0_i32_0 : i32, i32
  }
  func.func @transform_5(%arg0: i32) -> (i32, i32) {
    %c0_i32 = arith.constant 0 : i32
    %c0_i32_0 = arith.constant 0 : i32
    %c0_i32_1 = arith.constant 0 : i32
    return %c0_i32, %c0_i32_0 : i32, i32
  }
  func.func @transform_6(%arg0: i32) -> (i32, i32) {
    %c0_i32 = arith.constant 0 : i32
    %c0_i32_0 = arith.constant 0 : i32
    %c0_i32_1 = arith.constant 0 : i32
    return %c0_i32, %c0_i32_0 : i32, i32
  }
  func.func @transform_7(%arg0: i32) -> (i32, i32) {
    %c0_i32 = arith.constant 0 : i32
    %c0_i32_0 = arith.constant 0 : i32
    return %arg0, %c0_i32 : i32, i32
  }
}

module attributes {stable_mosaic.version = 11 : i64} {
  func.func @_ffn_resident_kernel(%arg0: i32, %arg1: memref<8x128xf32, #tpu.memory_space<vmem>>, %arg2: memref<1x128xf32, #tpu.memory_space<vmem>>, %arg3: memref<1x128xf32, #tpu.memory_space<vmem>>, %arg4: memref<128x128xf32, #tpu.memory_space<vmem>>, %arg5: memref<1x128xf32, #tpu.memory_space<vmem>>, %arg6: memref<128x128xf32, #tpu.memory_space<vmem>>, %arg7: memref<1x128xf32, #tpu.memory_space<vmem>>, %arg8: memref<8x128xf32, #tpu.memory_space<vmem>>) attributes {dimension_semantics = [#tpu.dimension_semantics<parallel>], iteration_bounds = array<i64: 2>, scalar_prefetch = 0 : i64, scratch_operands = 0 : i64, tpu.core_type = #tpu.core_type<tc>, window_params = [{transform_indices = @transform_0, window_bounds = array<i64: 8, 128>}, {pipeline_mode = #tpu.pipeline_mode<synchronous>, transform_indices = @transform_1, window_bounds = array<i64: 1, 128>}, {pipeline_mode = #tpu.pipeline_mode<synchronous>, transform_indices = @transform_2, window_bounds = array<i64: 1, 128>}, {pipeline_mode = #tpu.pipeline_mode<synchronous>, transform_indices = @transform_3, window_bounds = array<i64: 128, 128>}, {pipeline_mode = #tpu.pipeline_mode<synchronous>, transform_indices = @transform_4, window_bounds = array<i64: 1, 128>}, {pipeline_mode = #tpu.pipeline_mode<synchronous>, transform_indices = @transform_5, window_bounds = array<i64: 128, 128>}, {pipeline_mode = #tpu.pipeline_mode<synchronous>, transform_indices = @transform_6, window_bounds = array<i64: 1, 128>}, {transform_indices = @transform_7, window_bounds = array<i64: 8, 128>}]} {
    %c0 = arith.constant 0 : index
    %c0_0 = arith.constant 0 : index
    %0 = vector.load %arg1[%c0, %c0_0] : memref<8x128xf32, #tpu.memory_space<vmem>>, vector<8x128xf32>
    %cst = arith.constant dense<0.000000e+00> : vector<8xf32>
    %1 = vector.multi_reduction <add>, %0, %cst [1] : vector<8x128xf32> to vector<8xf32>
    %2 = vector.shape_cast %1 : vector<8xf32> to vector<8x1xf32>
    %cst_1 = arith.constant 3.125000e-02 : f32
    %3 = vector.broadcast %cst_1 : f32 to vector<8x1xf32>
    %4 = arith.mulf %2, %3 : vector<8x1xf32>
    %5 = vector.broadcast %4 : vector<8x1xf32> to vector<8x128xf32>
    %6 = arith.subf %0, %5 : vector<8x128xf32>
    %7 = tpu.iota {dimensions = array<i32: 1>} : vector<8x128xi32>
    %c32_i32 = arith.constant 32 : i32
    %8 = vector.broadcast %c32_i32 : i32 to vector<8x128xi32>
    %9 = arith.cmpi slt, %7, %8 : vector<8x128xi32>
    %cst_2 = arith.constant 0.000000e+00 : f32
    %10 = vector.broadcast %cst_2 : f32 to vector<8x128xf32>
    %11 = arith.select %9, %6, %10 : vector<8x128xi1>, vector<8x128xf32>
    %12 = arith.mulf %11, %11 : vector<8x128xf32>
    %cst_3 = arith.constant dense<0.000000e+00> : vector<8xf32>
    %13 = vector.multi_reduction <add>, %12, %cst_3 [1] : vector<8x128xf32> to vector<8xf32>
    %14 = vector.shape_cast %13 : vector<8xf32> to vector<8x1xf32>
    %cst_4 = arith.constant 3.125000e-02 : f32
    %15 = vector.broadcast %cst_4 : f32 to vector<8x1xf32>
    %16 = arith.mulf %14, %15 : vector<8x1xf32>
    %cst_5 = arith.constant 9.99999974E-6 : f32
    %17 = vector.broadcast %cst_5 : f32 to vector<8x1xf32>
    %18 = arith.addf %16, %17 : vector<8x1xf32>
    %19 = math.rsqrt %18 : vector<8x1xf32>
    %20 = vector.broadcast %19 : vector<8x1xf32> to vector<8x128xf32>
    %21 = arith.mulf %11, %20 : vector<8x128xf32>
    %c0_6 = arith.constant 0 : index
    %c0_7 = arith.constant 0 : index
    %22 = vector.load %arg2[%c0_6, %c0_7] : memref<1x128xf32, #tpu.memory_space<vmem>>, vector<1x128xf32>
    %23 = vector.broadcast %22 : vector<1x128xf32> to vector<8x128xf32>
    %24 = arith.mulf %21, %23 : vector<8x128xf32>
    %c0_8 = arith.constant 0 : index
    %c0_9 = arith.constant 0 : index
    %25 = vector.load %arg3[%c0_8, %c0_9] : memref<1x128xf32, #tpu.memory_space<vmem>>, vector<1x128xf32>
    %26 = vector.broadcast %25 : vector<1x128xf32> to vector<8x128xf32>
    %27 = arith.addf %24, %26 : vector<8x128xf32>
    %c0_10 = arith.constant 0 : index
    %c0_11 = arith.constant 0 : index
    %28 = vector.load %arg4[%c0_10, %c0_11] : memref<128x128xf32, #tpu.memory_space<vmem>>, vector<128x128xf32>
    %cst_12 = arith.constant dense<0.000000e+00> : vector<8x128xf32>
    %29 = tpu.matmul %27, %28, %cst_12 {dimension_numbers = #tpu.dot_dimension_numbers<[1], [0], [0], [1], [0, 0, 1, 1], [], []>} : vector<8x128xf32>, vector<128x128xf32>, vector<8x128xf32> -> vector<8x128xf32>
    %c0_13 = arith.constant 0 : index
    %c0_14 = arith.constant 0 : index
    %30 = vector.load %arg5[%c0_13, %c0_14] : memref<1x128xf32, #tpu.memory_space<vmem>>, vector<1x128xf32>
    %31 = vector.broadcast %30 : vector<1x128xf32> to vector<8x128xf32>
    %32 = arith.addf %29, %31 : vector<8x128xf32>
    %cst_15 = arith.constant 0.000000e+00 : f32
    %33 = vector.broadcast %cst_15 : f32 to vector<8x128xf32>
    %34 = arith.maximumf %32, %33 : vector<8x128xf32>
    %c0_16 = arith.constant 0 : index
    %c0_17 = arith.constant 0 : index
    %35 = vector.load %arg6[%c0_16, %c0_17] : memref<128x128xf32, #tpu.memory_space<vmem>>, vector<128x128xf32>
    %cst_18 = arith.constant dense<0.000000e+00> : vector<8x128xf32>
    %36 = tpu.matmul %34, %35, %cst_18 {dimension_numbers = #tpu.dot_dimension_numbers<[1], [0], [0], [1], [0, 0, 1, 1], [], []>} : vector<8x128xf32>, vector<128x128xf32>, vector<8x128xf32> -> vector<8x128xf32>
    %c0_19 = arith.constant 0 : index
    %c0_20 = arith.constant 0 : index
    %37 = vector.load %arg7[%c0_19, %c0_20] : memref<1x128xf32, #tpu.memory_space<vmem>>, vector<1x128xf32>
    %38 = vector.broadcast %37 : vector<1x128xf32> to vector<8x128xf32>
    %39 = arith.addf %36, %38 : vector<8x128xf32>
    %c0_21 = arith.constant 0 : index
    %c0_22 = arith.constant 0 : index
    %40 = vector.load %arg8[%c0_21, %c0_22] : memref<8x128xf32, #tpu.memory_space<vmem>>, vector<8x128xf32>
    tpu.vector_store %arg8[%c0_21, %c0_22], %39 {strides = array<i32>} : memref<8x128xf32, #tpu.memory_space<vmem>>, vector<8x128xf32>,
    return
  }
  func.func @transform_0(%arg0: i32) -> (i32, i32) {
    %c0_i32 = arith.constant 0 : i32
    %c0_i32_0 = arith.constant 0 : i32
    return %arg0, %c0_i32 : i32, i32
  }
  func.func @transform_1(%arg0: i32) -> (i32, i32) {
    %c0_i32 = arith.constant 0 : i32
    %c0_i32_0 = arith.constant 0 : i32
    %c0_i32_1 = arith.constant 0 : i32
    return %c0_i32, %c0_i32_0 : i32, i32
  }
  func.func @transform_2(%arg0: i32) -> (i32, i32) {
    %c0_i32 = arith.constant 0 : i32
    %c0_i32_0 = arith.constant 0 : i32
    %c0_i32_1 = arith.constant 0 : i32
    return %c0_i32, %c0_i32_0 : i32, i32
  }
  func.func @transform_3(%arg0: i32) -> (i32, i32) {
    %c0_i32 = arith.constant 0 : i32
    %c0_i32_0 = arith.constant 0 : i32
    %c0_i32_1 = arith.constant 0 : i32
    return %c0_i32, %c0_i32_0 : i32, i32
  }
  func.func @transform_4(%arg0: i32) -> (i32, i32) {
    %c0_i32 = arith.constant 0 : i32
    %c0_i32_0 = arith.constant 0 : i32
    %c0_i32_1 = arith.constant 0 : i32
    return %c0_i32, %c0_i32_0 : i32, i32
  }
  func.func @transform_5(%arg0: i32) -> (i32, i32) {
    %c0_i32 = arith.constant 0 : i32
    %c0_i32_0 = arith.constant 0 : i32
    %c0_i32_1 = arith.constant 0 : i32
    return %c0_i32, %c0_i32_0 : i32, i32
  }
  func.func @transform_6(%arg0: i32) -> (i32, i32) {
    %c0_i32 = arith.constant 0 : i32
    %c0_i32_0 = arith.constant 0 : i32
    %c0_i32_1 = arith.constant 0 : i32
    return %c0_i32, %c0_i32_0 : i32, i32
  }
  func.func @transform_7(%arg0: i32) -> (i32, i32) {
    %c0_i32 = arith.constant 0 : i32
    %c0_i32_0 = arith.constant 0 : i32
    return %arg0, %c0_i32 : i32, i32
  }
}

</mosaic_0001>

<bundles_post_ra>
// kernel: tpu_custom_call.1
= control target key start
LH: loop header
LB: loop body
LE: loop exit
PB: predicated region body
PF: predicated region fallthrough
CT: control target
= control target key end

     0   :  { %s1267_s0 = inlined_call_operand.hbm [shape: f32[16,128], index: 0, kind: input, shape index: {}]   ;;  %s1268_s1 = inlined_call_operand.vmem [shape: f32[1,128], index: 1, kind: input, shape index: {}]   ;;  %s1269_s2 = inlined_call_operand.vmem [shape: f32[1,128], index: 2, kind: input, shape index: {}]   ;;  %s1270_s3 = inlined_call_operand.hbm [shape: f32[128,128], index: 3, kind: input, shape index: {}]   ;;  %s1271_s4 = inlined_call_operand.vmem [shape: f32[1,128], index: 4, kind: input, shape index: {}]   ;;  %s1272_s5 = inlined_call_operand.hbm [shape: f32[128,128], index: 5, kind: input, shape index: {}]   ;;  %s1273_s6 = inlined_call_operand.vmem [shape: f32[1,128], index: 6, kind: input, shape index: {}]   ;;  %s1274_s7 = inlined_call_operand.hbm [shape: f32[16,128], index: 7, kind: output, shape index: {}]  }
   0x1   :  { %1279 = sst [smem:[#allocation12_spill]] %s1270_s3 }
   0x2   :  { %1280 = sst [smem:[#allocation13_spill]] %s1272_s5 }
   0x3   :  { %12 = vsyncpa [#allocation3], 0 }
   0x4   :  { %14 = vsyncpa [#allocation3 + $0x1], 0 }
   0x5   :  { %15 = vsyncpa [#allocation6], 0 }
   0x6   :  { %16 = vsyncpa [#allocation4], 0 }
   0x7   :  { %18 = vsyncpa [#allocation4 + $0x1], 0  ;;  %s1041_s24 = smov 0   ;;  %s1043_s25 = smov 0  }
   0x8   :  { %s1045_s26 = smov 0   ;;  %s1047_s27 = smov 0  }
   0x9 LB: > { %s1062_s28 = sadd.s32 4294967295, %s991_s27   ;;  %s646_s29 = sadd.s32 4294967294, %s991_s27   ;;  %s991_s27 = sphi %s1047_s27, %s1300_s27   ;;  %s987_s26 = sphi %s1045_s26, %s1299_s26   ;;  %s983_s25 = sphi %s1043_s25, %s1298_s25   ;;  %s979_s24 = sphi %s1041_s24, %s1297_s24  }
   0xa   : > { %p44_p0 = scmp.ne.s32.totalorder %s983_s25, %s979_s24  ;;  %p1275_p1 = scmp.eq.s32.totalorder %s1062_s28, 0 }
   0xb   : > { %p200_p3 = scmp.eq.s32.totalorder %s646_s29, 1  ;;  %p647_p5 = scmp.ge.s32.totalorder %s991_s27, 1 }
   0xc   : > { %p1071_p4 = por %p1275_p1, %p44_p0  ;;  %p207_p7 = scmp.lt.s32.totalorder %s991_s27, 3 }
   0xd   : > { %p1076_p6 = por %p200_p3, %p44_p0  ;;  %s993_s10 = smov [#allocation5]  }
   0xe   : > { %s1281_s30 = scalar_select %p1071_p4, 1, 0 }
   0xf   : > { %s1282_s8 = scalar_select %p1076_p6, 1, 0 }
  0x10   : > { %p1081_p8 = pnand %p647_p5, %p207_p7  ;;  %s225_s11 = sshll.u32 %s993_s10, 4  ;;  %s226_s11 = int_to_ptr.vmem [resolvable:$true] %s225_s11 }
  0x11   : > { %s994_s13 = smov [#allocation7]   ;;  %s854_s15 = scalar_lea.vmem %s226_s11, 2048 }
  0x12   : > { %s1283_s9 = scalar_select %p1081_p8, 1, 0 }
  0x13   : > { %p782_p9 = pneg %p1081_p8  ;;  %s241_s14 = sshll.u32 %s994_s13, 4  ;;  %s242_s14 = int_to_ptr.vmem [resolvable:$true] %s241_s14 }
  0x14   : > { %p855_p13 = scmp.ne.s32.totalorder %s226_s11, %s854_s15  ;;  %p862_p5 = scmp.lt.s32.totalorder %s226_s11, %s226_s11 }
  0x15   : > { %p1090_p11 = pnand %p782_p9, %p1275_p1  ;;  %p863_p7 = scmp.lt.s32.totalorder %s854_s15, %s854_s15 }
  0x17   : > { %p845_p12 = pneg %p1090_p11  ;;  %p864_p10 = por %p863_p7, %p862_p5 }
  0x19   : > { %p857_p0 = pnand %p855_p13, %p845_p12 }
  0x1b   : > { %p858_p3 = pneg %p857_p0 }
  0x1d   : > { %p865_p9 = pnand %p864_p10, %p858_p3 }
  0x1f   : > { %868 = shalt.err (!%p865_p9)
}
  0x20   : > { %s995_s16 = smov 128   ;;  %s996_s17 = smov 8  }
  0x21   : > { %s1285_s3 = sld [smem:[#allocation12_spill]]  ;;  %s880_s20 = scalar_lea.vmem %s242_s14, 2048 }
  0x22   : > { %p881_p1 = scmp.ne.s32.totalorder %s242_s14, %s880_s20  ;;  %p888_p2 = scmp.lt.s32.totalorder %s242_s14, %s242_s14 }
  0x23   : > { %p889_p6 = scmp.lt.s32.totalorder %s880_s20, %s880_s20 }
  0x24   : > { %p883_p13 = pnand %p881_p1, %p845_p12 }
  0x25   : > { %p890_p5 = por %p889_p6, %p888_p2 }
  0x26   : > { %p884_p0 = pneg %p883_p13 }
  0x27   : > { %785 = dma.hbm_to_vmem [thread:$0]  (!%p1090_p11), %s1285_s3, 2048, %s226_s11, [#allocation6], %s995_s16, %s995_s16, %s996_s17  }
  0x28   : > { %p891_p10 = pnand %p890_p5, %p884_p0 }
  0x2a   : > { %894 = shalt.err (!%p891_p10)
}
  0x2b   : > { %s1286_s5 = sld [smem:[#allocation13_spill]]  ;;  %s1113_s23 = sadd.s32 1, %s991_s27  }
  0x2c   : > { %s31_s29 = sadd.s32 1, %s987_s26  ;;  %s28_s10 = ssub.s32 %s991_s27, %s1113_s23 }
  0x2d   : > { %p38_p1 = scmp.ne.s32.totalorder %s987_s26, %s983_s25  ;;  %p29_p2 = scmp.eq.s32.totalorder %s28_s10, 0 }
  0x2e   : > { %p39_p6 = scmp.eq.s32.totalorder %s991_s27, 0  ;;  %p1287_p12 = scmp.eq.s32.totalorder %s1062_s28, 1 }
  0x2f   : > { %p799_p7 = scmp.lt.s32.totalorder %s991_s27, 2  ;;  %s258_s13 = sand.u32 1, %s987_s26  }
  0x30   : > { %p1123_p3 = por %p1287_p12, %p38_p1  ;;  %p40_p9 = por %p39_p6, %p38_p1 }
  0x31   : > { %788 = dma.hbm_to_vmem [thread:$0]  (!%p1090_p11), %s1286_s5, 2048, %s242_s14, [#allocation6], %s995_s16, %s995_s16, %s996_s17  }
  0x32   : > { %s1288_s11 = scalar_select %p1123_p3, 1, 0 }
  0x33   : > { %s1129_s12 = scalar_select %p29_p2, %s987_s26, %s31_s29  }
  0x34   : > { %s651_s15 = sshll.u32 %s258_s13, 3  ;;  %s652_s14 = sshll.u32 %s991_s27, 7 }
  0x35   : > { %s1136_s18 = scalar_lea.hbm %s1267_s0, %s652_s14  ;;  %s262_s19 = scalar_lea.vmem [#allocation2], %s651_s15 }
  0x36   : > { %s269_s20 = sshll.u32 %s262_s19, 4  ;;  %p1138_p11 = pnand %p799_p7, %p40_p9  ;;  %s270_s20 = int_to_ptr.vmem [resolvable:$true] %s269_s20 }
  0x37   : > { %s259_s22 = scalar_lea.sflag [#allocation3], %s258_s13  ;;  %s895_s29 = scalar_lea.hbm %s1136_s18, 128 }
  0x38   : > { %p896_p13 = scmp.ne.s32.totalorder %s1136_s18, %s895_s29  ;;  %p897_p0 = pneg %p1138_p11 }
  0x39   : > { %s900_s16 = scalar_lea.hbm %s1267_s0, 256  ;;  %p901_p1 = scmp.lt.s32.totalorder %s1136_s18, %s1267_s0 }
  0x3a   : > { %p898_p5 = pnand %p897_p0, %p896_p13  ;;  %p902_p2 = scmp.lt.s32.totalorder %s900_s16, %s895_s29 }
  0x3c   : > { %p899_p10 = pneg %p898_p5  ;;  %p903_p6 = por %p902_p2, %p901_p1 }
  0x3e   : > { %p904_p12 = pnand %p903_p6, %p899_p10 }
  0x40   : > { %907 = shalt.err (!%p904_p12)
}
  0x41   : > { %s908_s19 = scalar_lea.vmem %s270_s20, 128  ;;  %s997_s13 = smov [#allocation2]  }
  0x42   : > { %p909_p7 = scmp.ne.s32.totalorder %s270_s20, %s908_s19  ;;  %s913_s3 = sshll.u32 %s997_s13, 4  ;;  %s914_s3 = int_to_ptr.vmem [resolvable:$false] %s913_s3 }
  0x43   : > { %s915_s5 = scalar_lea.vmem %s914_s3, 256  ;;  %p916_p13 = scmp.lt.s32.totalorder %s270_s20, %s914_s3 }
  0x44   : > { %p911_p9 = pnand %p909_p7, %p897_p0  ;;  %p917_p5 = scmp.lt.s32.totalorder %s915_s5, %s908_s19 }
  0x46   : > { %p912_p3 = pneg %p911_p9  ;;  %p918_p4 = por %p917_p5, %p916_p13 }
  0x48   : > { %p919_p8 = pnand %p918_p4, %p912_p3 }
  0x4a   : > { %922 = shalt.err (!%p919_p8)
}
  0x4b   : > { %792 = dma.hbm_to_vmem [thread:$0]  (!%p1138_p11), %s1136_s18, 128, %s270_s20, %s259_s22  }
  0x4c   : > { %p1290_p10 = scmp.ne.s32.totalorder %s1283_s9, 0 }
  0x4d   : > { %s1159_s29 = sand.u32 (!%p1290_p10), 1, %s983_s25   ;;  %p1291_p4 = scmp.ne.s32.totalorder (!%p1290_p10), %s1281_s30, 0 }
  0x4e   : > { %278 = sbr.rel (%p1290_p10) target bundleno = 800 (0x320), region = 48  ;;  %s654_s10 = sshll.u32 (!%p1290_p10), %s1159_s29, 3 }
  0x4f   : > { %s281_s3 = scalar_lea.sflag (!%p1290_p10), [#allocation3], %s1159_s29  ;;  %s284_s5 = scalar_lea.vmem (!%p1290_p10), [#allocation2], %s654_s10 }
  0x53   : > { %966 = dma.done.wait (%p1291_p4), %s281_s3, 128  }
  0x54   : > { %968 = vsyncadd (%p1291_p4), %s281_s3, 4294967168  ;;  %p1292_p8 = scmp.eq.s32.totalorder %s1062_s28, 0 }
  0x56   : > { %970 = dma.done.wait (%p1292_p8), [#allocation6], 4096   ;;  %p1293_p3 = pmov %p1292_p8 }
  0x57   : > { %v323_v0 = vld [vmem:[%s284_s5] sm:$0xff]  ;;  %v998_v2 = vmov 0.0   ;;  %v368_v4 = vld [vmem:[#allocation5 + $0x68] sm:$0xff]  ;;  %v367_v5 = vld [vmem:[#allocation5 + $0x60] sm:$0xff]  ;;  %v328_v6 = vlaneseq  ;;  %vm999_vm1 = vmmov 0   ;;  %s663_s17 = sshll.u32 %s1062_s28, 7 }
  0x58   : > { %972 = vsyncadd (%p1293_p3), [#allocation6], 4294963200  ;;  %324 = vadd.xlane.f32.xlu0 %v323_v0  ;;  %v370_v1 = vld [vmem:[#allocation5 + $0x78] sm:$0xff]  ;;  %700 = vmatprep.subr.mxu0 %v998_v2  ;;  %v369_v3 = vld [vmem:[#allocation5 + $0x70] sm:$0xff]  ;;  %s322_s15 = scalar_lea.vmem [#allocation8], %s654_s10  ;;  %s1230_s5 = scalar_lea.hbm %s1274_s7, %s663_s17 }
  0x59   : > { %735 = vmatprep.subr.mxu1 %v998_v2  ;;  %701 = vmatpush3.msra.mxu0 %v370_v1  ;;  %v329_v7 = vand.u32 127, %v328_v6  ;;  %v366_v13 = vld [vmem:[#allocation5 + $0x58] sm:$0xff]  ;;  %v365_v14 = vld [vmem:[#allocation5 + $0x50] sm:$0xff]  ;;  %v364_v15 = vld [vmem:[#allocation5 + $0x48] sm:$0xff]  ;;  %s557_s19 = sshll.u32 %s322_s15, 4  ;;  %s544_s30 = scalar_lea.sflag [#allocation4], %s1159_s29  ;;  %s558_s19 = int_to_ptr.vmem [resolvable:$true] %s557_s19 }
  0x5a   : > { %702 = vmatprep.subr.mxu0 %v998_v2  ;;  %v363_v16 = vld [vmem:[#allocation5 + $0x40] sm:$0xff]  ;;  %732 = vmatprep.mubr.msk.f32.mxu0 %vm999_vm1, %v998_v2  ;;  %v362_v17 = vld [vmem:[#allocation5 + $0x38] sm:$0xff]  ;;  %v361_v18 = vld [vmem:[#allocation5 + $0x30] sm:$0xff]  ;;  %s923_s9 = scalar_lea.vmem %s558_s19, 128  ;;  %p1294_p0 = scmp.ne.s32.totalorder %s1288_s11, 0 }
  0x5b   : > { %703 = vmatpush3.msra.mxu0 %v369_v3  ;;  %vm330_vm0 = vcmp.lt.s32.totalorder %v329_v7, 32  ;;  %767 = vmatprep.mubr.msk.f32.mxu1 %vm999_vm1, %v998_v2  ;;  %v360_v19 = vld [vmem:[#allocation5 + $0x28] sm:$0xff]  ;;  %v359_v20 = vld [vmem:[#allocation5 + $0x20] sm:$0xff]  ;;  %v358_v21 = vld [vmem:[#allocation5 + $0x18] sm:$0xff]  ;;  %p924_p11 = scmp.ne.s32.totalorder %s558_s19, %s923_s9  ;;  %s1000_s28 = smov [#allocation8]  }
  0x5c   : > { %704 = vmatprep.subr.mxu0 %v998_v2  ;;  %v357_v22 = vld [vmem:[#allocation5 + $0x10] sm:$0xff]  ;;  %v356_v23 = vld [vmem:[#allocation5 + $0x8] sm:$0xff]  ;;  %v355_v24 = vld [vmem:[#allocation5] sm:$0xff]  ;;  %s927_s18 = sshll.u32 %s1000_s28, 4  ;;  %s928_s18 = int_to_ptr.vmem [resolvable:$false] %s927_s18 }
  0x5d   : > { %705 = vmatpush3.msra.mxu0 %v368_v4  ;;  %v464_v25 = vld [vmem:[#allocation7 + $0x78] sm:$0xff]  ;;  %v463_v26 = vld [vmem:[#allocation7 + $0x70] sm:$0xff]  ;;  %v462_v27 = vld [vmem:[#allocation7 + $0x68] sm:$0xff]  ;;  %p925_p1 = pnand %p924_p11, %p1294_p0  ;;  %s929_s10 = scalar_lea.vmem %s928_s18, 256 }
  0x5e   : > { %706 = vmatprep.subr.mxu0 %v998_v2  ;;  %736 = vmatpush3.msra.mxu1 %v464_v25  ;;  %v461_v28 = vld [vmem:[#allocation7 + $0x60] sm:$0xff]  ;;  %v460_v29 = vld [vmem:[#allocation7 + $0x58] sm:$0xff]  ;;  %v459_v30 = vld [vmem:[#allocation7 + $0x50] sm:$0xff]  ;;  %p930_p6 = scmp.lt.s32.totalorder %s558_s19, %s928_s18  ;;  %p931_p12 = scmp.lt.s32.totalorder %s929_s10, %s923_s9 }
  0x5f   : > { %707 = vmatpush3.msra.mxu0 %v367_v5  ;;  %737 = vmatprep.subr.mxu1 %v998_v2  ;;  %v458_v31 = vld [vmem:[#allocation7 + $0x48] sm:$0xff]  ;;  %v457_v32 = vld [vmem:[#allocation7 + $0x40] sm:$0xff]  ;;  %v456_v33 = vld [vmem:[#allocation7 + $0x38] sm:$0xff]  ;;  %p926_p2 = pneg %p925_p1 }
  0x60   : > { %708 = vmatprep.subr.mxu0 %v998_v2  ;;  %738 = vmatpush3.msra.mxu1 %v463_v26  ;;  %v455_v34 = vld [vmem:[#allocation7 + $0x30] sm:$0xff]  ;;  %v454_v35 = vld [vmem:[#allocation7 + $0x28] sm:$0xff]  ;;  %v453_v36 = vld [vmem:[#allocation7 + $0x20] sm:$0xff]  ;;  %p932_p7 = por %p931_p12, %p930_p6 }
  0x61   : > { %709 = vmatpush3.msra.mxu0 %v366_v13  ;;  %739 = vmatprep.subr.mxu1 %v998_v2  ;;  %v452_v37 = vld [vmem:[#allocation7 + $0x18] sm:$0xff]  ;;  %v658_v42 = vld [vmem:[%s1268_s1] ss:$0 sm:$0xff]  ;;  %v450_v48 = vld [vmem:[#allocation7 + $0x8] sm:$0xff] }
  0x62   : > { %710 = vmatprep.subr.mxu0 %v998_v2  ;;  %740 = vmatpush3.msra.mxu1 %v462_v27  ;;  %v659_v44 = vld [vmem:[%s1269_s2] ss:$0 sm:$0xff]  ;;  %v449_v49 = vld [vmem:[#allocation7] sm:$0xff]  ;;  %p933_p9 = pnand %p932_p7, %p926_p2 }
  0x63   : > { %711 = vmatpush3.msra.mxu0 %v365_v14  ;;  %741 = vmatprep.subr.mxu1 %v998_v2  ;;  %v451_v47 = vld [vmem:[#allocation7 + $0x10] sm:$0xff] }
  0x64   : > { %712 = vmatprep.subr.mxu0 %v998_v2  ;;  %742 = vmatpush3.msra.mxu1 %v461_v28  ;;  %v660_v50 = vld [vmem:[%s1271_s4] ss:$0 sm:$0xff] }
  0x65   : > { %713 = vmatpush3.msra.mxu0 %v364_v15  ;;  %743 = vmatprep.subr.mxu1 %v998_v2  ;;  %v661_v55 = vld [vmem:[%s1273_s6] ss:$0 sm:$0xff] }
  0x66   : > { %714 = vmatprep.subr.mxu0 %v998_v2  ;;  %744 = vmatpush3.msra.mxu1 %v460_v29 }
  0x67   : > { %715 = vmatpush3.msra.mxu0 %v363_v16  ;;  %745 = vmatprep.subr.mxu1 %v998_v2 }
  0x68   : > { %716 = vmatprep.subr.mxu0 %v998_v2  ;;  %746 = vmatpush3.msra.mxu1 %v459_v30 }
  0x69   : > { %717 = vmatpush3.msra.mxu0 %v362_v17  ;;  %747 = vmatprep.subr.mxu1 %v998_v2 }
  0x6a   : > { %718 = vmatprep.subr.mxu0 %v998_v2  ;;  %748 = vmatpush3.msra.mxu1 %v458_v31 }
  0x6b   : > { %719 = vmatpush3.msra.mxu0 %v361_v18  ;;  %749 = vmatprep.subr.mxu1 %v998_v2 }
  0x6c   : > { %720 = vmatprep.subr.mxu0 %v998_v2  ;;  %750 = vmatpush3.msra.mxu1 %v457_v32 }
  0x6d   : > { %721 = vmatpush3.msra.mxu0 %v360_v19  ;;  %751 = vmatprep.subr.mxu1 %v998_v2 }
  0x6e   : > { %722 = vmatprep.subr.mxu0 %v998_v2  ;;  %752 = vmatpush3.msra.mxu1 %v456_v33 }
  0x6f   : > { %723 = vmatpush3.msra.mxu0 %v359_v20  ;;  %753 = vmatprep.subr.mxu1 %v998_v2 }
  0x70   : > { %724 = vmatprep.subr.mxu0 %v998_v2  ;;  %754 = vmatpush3.msra.mxu1 %v455_v34 }
  0x71   : > { %725 = vmatpush3.msra.mxu0 %v358_v21  ;;  %755 = vmatprep.subr.mxu1 %v998_v2 }
  0x72   : > { %726 = vmatprep.subr.mxu0 %v998_v2  ;;  %756 = vmatpush3.msra.mxu1 %v454_v35 }
  0x73   : > { %727 = vmatpush3.msra.mxu0 %v357_v22  ;;  %757 = vmatprep.subr.mxu1 %v998_v2 }
  0x74   : > { %728 = vmatprep.subr.mxu0 %v998_v2  ;;  %758 = vmatpush3.msra.mxu1 %v453_v36 }
  0x75   : > { %729 = vmatpush3.msra.mxu0 %v356_v23  ;;  %759 = vmatprep.subr.mxu1 %v998_v2 }
  0x76   : > { %730 = vmatprep.subr.mxu0 %v998_v2  ;;  %760 = vmatpush3.msra.mxu1 %v452_v37 }
  0x77   : > { %731 = vmatpush3.msra.mxu0 %v355_v24  ;;  %761 = vmatprep.subr.mxu1 %v998_v2 }
  0x78   : > { %762 = vmatpush3.msra.mxu1 %v451_v47 }
  0x79   : > { %763 = vmatprep.subr.mxu1 %v998_v2 }
  0x7a   : > { %764 = vmatpush3.msra.mxu1 %v450_v48 }
  0x7b   : > { %765 = vmatprep.subr.mxu1 %v998_v2 }
  0x7c   : > { %766 = vmatpush3.msra.mxu1 %v449_v49 }
  0xe1   : > { %v325_v8 = vpop.xlane.xlu0 %324 }
  0xe2   : > { %v326_v9 = vmul.f32 0.03125, %v325_v8 }
  0xe4   : > { %v327_v10 = vsub.f32 %v323_v0, %v326_v9 }
  0xe6   : > { %v1179_v11 = vsel %vm330_vm0, %v327_v10, 0.0 }
  0xe7   : > { %v332_v12 = vmul.f32 %v1179_v11, %v1179_v11 }
  0xe9   : > { %333 = vadd.xlane.f32.xlu0 %v332_v12 }
 0x172   : > { %v334_v38 = vpop.xlane.xlu0 %333 }
 0x173   : > { %v335_v39 = vmul.f32 0.03125, %v334_v38 }
 0x175   : > { %v336_v40 = vadd.f32 1e-05, %v335_v39 }
 0x177   : > { %841 = vrsqrt.f32 %v336_v40 }
 0x184   : > { %v842_v41 = vpop.eup %841 }
 0x185   : > { %v338_v43 = vmul.f32 %v842_v41, %v1179_v11 }
 0x187   : > { %v346_v45 = vmul.f32 %v658_v42, %v338_v43 }
 0x189   : > { %v354_v46 = vadd.f32 %v659_v44, %v346_v45 }
 0x18b   : > { %733 = vmatmul.mubr.f32.vlgmr.msra.gmra.mxu0 %v354_v46 }
 0x24b   : > { %v444_v51 = vpop.f32.mrf.mxu0 }
 0x24c   : > { %v445_v52 = vadd.f32 %v660_v50, %v444_v51 }
 0x24d   : > { %v734_v53 = vpop.f32.mrf.mxu0 }
 0x24e   : > { %v448_v54 = vmax.f32 %v445_v52, 0.0 }
 0x250   : > { %768 = vmatmul.mubr.f32.vlgmr.msra.gmra.mxu1 %v448_v54 }
 0x310   : > { %v538_v56 = vpop.f32.mrf.mxu1 }
 0x311   : > { %v539_v57 = vadd.f32 %v661_v55, %v538_v56 }
 0x312   : > { %v769_v58 = vpop.f32.mrf.mxu1 }
 0x313   : > { %542 = vst [vmem:[%s322_s15] sm:$0xff] %v539_v57 }
 0x314   : > { %936 = shalt.err (!%p933_p9)
}
 0x315   : > { %s937_s20 = scalar_lea.hbm %s1230_s5, 128  ;;  %s941_s22 = scalar_lea.hbm %s1274_s7, 256 }
 0x316   : > { %p938_p13 = scmp.ne.s32.totalorder %s1230_s5, %s937_s20  ;;  %p942_p4 = scmp.lt.s32.totalorder %s1230_s5, %s1274_s7 }
 0x317   : > { %p943_p8 = scmp.lt.s32.totalorder %s941_s22, %s937_s20 }
 0x318   : > { %p939_p5 = pnand %p938_p13, %p1294_p0 }
 0x319   : > { %p944_p3 = por %p943_p8, %p942_p4 }
 0x31a   : > { %p940_p10 = pneg %p939_p5 }
 0x31c   : > { %p945_p11 = pnand %p944_p3, %p940_p10 }
 0x31e   : > { %948 = shalt.err (!%p945_p11)
}
 0x31f   : > { %780 = dma.vmem_to_hbm [thread:$0]  (%p1294_p0), %s558_s19, 128, %s1230_s5, %s544_s30  }
 0x320 PF: > { %s569_s17 = sand.u32 1, %s979_s24   ;;  %p1295_p1 = scmp.ne.s32.totalorder %s1282_s8, 0 }
 0x321   : > { %p1296_p2 = scmp.ge.s32.totalorder %s991_s27, 2  ;;  %s570_s15 = scalar_lea.sflag [#allocation4], %s569_s17 }
 0x323   : > { %p794_p6 = pnand %p1296_p2, %p1295_p1 }
 0x325   : > { %p795_p12 = pneg %p794_p6 }
 0x327   : > { %974 = dma.done.wait (%p795_p12), %s570_s15, 128  }
 0x328   : > { %976 = vsyncadd (%p795_p12), %s570_s15, 4294967168  ;;  %p21_p7 = scmp.ge.s32.totalorder %s1113_s23, 4   ;;  %s1297_s24 = smov %s983_s25 }
 0x329   : > { %s1298_s25 = smov %s987_s26  ;;  %s1299_s26 = smov %s1129_s12 }
 0x32a   : > { %s1300_s27 = smov %s1113_s23  ;;  %23 = sbr.rel (!%p21_p7) target bundleno = 9 (0x9), region = 101 }
 0x32f   :  { %575 = vsyncpa [#allocation3], 1 }
 0x330   :  { %577 = vsyncpa [#allocation3 + $0x1], 1 }
 0x331   :  { %578 = vsyncpa [#allocation6], 1 }
 0x332   :  { %579 = vsyncpa [#allocation4], 1 }
 0x333   :  { %581 = vsyncpa [#allocation4 + $0x1], 1 }

// kernel: tpu_custom_call.1
= control target key start
LH: loop header
LB: loop body
LE: loop exit
PB: predicated region body
PF: predicated region fallthrough
CT: control target
= control target key end

     0   :  { %s1267_s0 = inlined_call_operand.hbm [shape: f32[16,128], index: 0, kind: input, shape index: {}]   ;;  %s1268_s1 = inlined_call_operand.vmem [shape: f32[1,128], index: 1, kind: input, shape index: {}]   ;;  %s1269_s2 = inlined_call_operand.vmem [shape: f32[1,128], index: 2, kind: input, shape index: {}]   ;;  %s1270_s3 = inlined_call_operand.hbm [shape: f32[128,128], index: 3, kind: input, shape index: {}]   ;;  %s1271_s4 = inlined_call_operand.vmem [shape: f32[1,128], index: 4, kind: input, shape index: {}]   ;;  %s1272_s5 = inlined_call_operand.hbm [shape: f32[128,128], index: 5, kind: input, shape index: {}]   ;;  %s1273_s6 = inlined_call_operand.vmem [shape: f32[1,128], index: 6, kind: input, shape index: {}]   ;;  %s1274_s7 = inlined_call_operand.hbm [shape: f32[16,128], index: 7, kind: output, shape index: {}]  }
   0x1   :  { %1279 = sst [smem:[#allocation12_spill]] %s1270_s3 }
   0x2   :  { %1280 = sst [smem:[#allocation13_spill]] %s1272_s5 }
   0x3   :  { %12 = vsyncpa [#allocation3], 0 }
   0x4   :  { %14 = vsyncpa [#allocation3 + $0x1], 0 }
   0x5   :  { %15 = vsyncpa [#allocation6], 0 }
   0x6   :  { %16 = vsyncpa [#allocation4], 0 }
   0x7   :  { %18 = vsyncpa [#allocation4 + $0x1], 0  ;;  %s1041_s24 = smov 0   ;;  %s1043_s25 = smov 0  }
   0x8   :  { %s1045_s26 = smov 0   ;;  %s1047_s27 = smov 0  }
   0x9 LB: > { %s1062_s28 = sadd.s32 4294967295, %s991_s27   ;;  %s646_s29 = sadd.s32 4294967294, %s991_s27   ;;  %s991_s27 = sphi %s1047_s27, %s1300_s27   ;;  %s987_s26 = sphi %s1045_s26, %s1299_s26   ;;  %s983_s25 = sphi %s1043_s25, %s1298_s25   ;;  %s979_s24 = sphi %s1041_s24, %s1297_s24  }
   0xa   : > { %p44_p0 = scmp.ne.s32.totalorder %s983_s25, %s979_s24  ;;  %p1275_p1 = scmp.eq.s32.totalorder %s1062_s28, 0 }
   0xb   : > { %p200_p3 = scmp.eq.s32.totalorder %s646_s29, 1  ;;  %p647_p5 = scmp.ge.s32.totalorder %s991_s27, 1 }
   0xc   : > { %p1071_p4 = por %p1275_p1, %p44_p0  ;;  %p207_p7 = scmp.lt.s32.totalorder %s991_s27, 3 }
   0xd   : > { %p1076_p6 = por %p200_p3, %p44_p0  ;;  %s993_s10 = smov [#allocation5]  }
   0xe   : > { %s1281_s30 = scalar_select %p1071_p4, 1, 0 }
   0xf   : > { %s1282_s8 = scalar_select %p1076_p6, 1, 0 }
  0x10   : > { %p1081_p8 = pnand %p647_p5, %p207_p7  ;;  %s225_s11 = sshll.u32 %s993_s10, 4  ;;  %s226_s11 = int_to_ptr.vmem [resolvable:$true] %s225_s11 }
  0x11   : > { %s994_s13 = smov [#allocation7]   ;;  %s854_s15 = scalar_lea.vmem %s226_s11, 2048 }
  0x12   : > { %s1283_s9 = scalar_select %p1081_p8, 1, 0 }
  0x13   : > { %p782_p9 = pneg %p1081_p8  ;;  %s241_s14 = sshll.u32 %s994_s13, 4  ;;  %s242_s14 = int_to_ptr.vmem [resolvable:$true] %s241_s14 }
  0x14   : > { %p855_p13 = scmp.ne.s32.totalorder %s226_s11, %s854_s15  ;;  %p862_p5 = scmp.lt.s32.totalorder %s226_s11, %s226_s11 }
  0x15   : > { %p1090_p11 = pnand %p782_p9, %p1275_p1  ;;  %p863_p7 = scmp.lt.s32.totalorder %s854_s15, %s854_s15 }
  0x17   : > { %p845_p12 = pneg %p1090_p11  ;;  %p864_p10 = por %p863_p7, %p862_p5 }
  0x19   : > { %p857_p0 = pnand %p855_p13, %p845_p12 }
  0x1b   : > { %p858_p3 = pneg %p857_p0 }
  0x1d   : > { %p865_p9 = pnand %p864_p10, %p858_p3 }
  0x1f   : > { %868 = shalt.err (!%p865_p9)
}
  0x20   : > { %s995_s16 = smov 128   ;;  %s996_s17 = smov 8  }
  0x21   : > { %s1285_s3 = sld [smem:[#allocation12_spill]]  ;;  %s880_s20 = scalar_lea.vmem %s242_s14, 2048 }
  0x22   : > { %p881_p1 = scmp.ne.s32.totalorder %s242_s14, %s880_s20  ;;  %p888_p2 = scmp.lt.s32.totalorder %s242_s14, %s242_s14 }
  0x23   : > { %p889_p6 = scmp.lt.s32.totalorder %s880_s20, %s880_s20 }
  0x24   : > { %p883_p13 = pnand %p881_p1, %p845_p12 }
  0x25   : > { %p890_p5 = por %p889_p6, %p888_p2 }
  0x26   : > { %p884_p0 = pneg %p883_p13 }
  0x27   : > { %785 = dma.hbm_to_vmem [thread:$0]  (!%p1090_p11), %s1285_s3, 2048, %s226_s11, [#allocation6], %s995_s16, %s995_s16, %s996_s17  }
  0x28   : > { %p891_p10 = pnand %p890_p5, %p884_p0 }
  0x2a   : > { %894 = shalt.err (!%p891_p10)
}
  0x2b   : > { %s1286_s5 = sld [smem:[#allocation13_spill]]  ;;  %s1113_s23 = sadd.s32 1, %s991_s27  }
  0x2c   : > { %s31_s29 = sadd.s32 1, %s987_s26  ;;  %s28_s10 = ssub.s32 %s991_s27, %s1113_s23 }
  0x2d   : > { %p38_p1 = scmp.ne.s32.totalorder %s987_s26, %s983_s25  ;;  %p29_p2 = scmp.eq.s32.totalorder %s28_s10, 0 }
  0x2e   : > { %p39_p6 = scmp.eq.s32.totalorder %s991_s27, 0  ;;  %p1287_p12 = scmp.eq.s32.totalorder %s1062_s28, 1 }
  0x2f   : > { %p799_p7 = scmp.lt.s32.totalorder %s991_s27, 2  ;;  %s258_s13 = sand.u32 1, %s987_s26  }
  0x30   : > { %p1123_p3 = por %p1287_p12, %p38_p1  ;;  %p40_p9 = por %p39_p6, %p38_p1 }
  0x31   : > { %788 = dma.hbm_to_vmem [thread:$0]  (!%p1090_p11), %s1286_s5, 2048, %s242_s14, [#allocation6], %s995_s16, %s995_s16, %s996_s17  }
  0x32   : > { %s1288_s11 = scalar_select %p1123_p3, 1, 0 }
  0x33   : > { %s1129_s12 = scalar_select %p29_p2, %s987_s26, %s31_s29  }
  0x34   : > { %s651_s15 = sshll.u32 %s258_s13, 3  ;;  %s652_s14 = sshll.u32 %s991_s27, 7 }
  0x35   : > { %s1136_s18 = scalar_lea.hbm %s1267_s0, %s652_s14  ;;  %s262_s19 = scalar_lea.vmem [#allocation2], %s651_s15 }
  0x36   : > { %s269_s20 = sshll.u32 %s262_s19, 4  ;;  %p1138_p11 = pnand %p799_p7, %p40_p9  ;;  %s270_s20 = int_to_ptr.vmem [resolvable:$true] %s269_s20 }
  0x37   : > { %s259_s22 = scalar_lea.sflag [#allocation3], %s258_s13  ;;  %s895_s29 = scalar_lea.hbm %s1136_s18, 128 }
  0x38   : > { %p896_p13 = scmp.ne.s32.totalorder %s1136_s18, %s895_s29  ;;  %p897_p0 = pneg %p1138_p11 }
  0x39   : > { %s900_s16 = scalar_lea.hbm %s1267_s0, 256  ;;  %p901_p1 = scmp.lt.s32.totalorder %s1136_s18, %s1267_s0 }
  0x3a   : > { %p898_p5 = pnand %p897_p0, %p896_p13  ;;  %p902_p2 = scmp.lt.s32.totalorder %s900_s16, %s895_s29 }
  0x3c   : > { %p899_p10 = pneg %p898_p5  ;;  %p903_p6 = por %p902_p2, %p901_p1 }
  0x3e   : > { %p904_p12 = pnand %p903_p6, %p899_p10 }
  0x40   : > { %907 = shalt.err (!%p904_p12)
}
  0x41   : > { %s908_s19 = scalar_lea.vmem %s270_s20, 128  ;;  %s997_s13 = smov [#allocation2]  }
  0x42   : > { %p909_p7 = scmp.ne.s32.totalorder %s270_s20, %s908_s19  ;;  %s913_s3 = sshll.u32 %s997_s13, 4  ;;  %s914_s3 = int_to_ptr.vmem [resolvable:$false] %s913_s3 }
  0x43   : > { %s915_s5 = scalar_lea.vmem %s914_s3, 256  ;;  %p916_p13 = scmp.lt.s32.totalorder %s270_s20, %s914_s3 }
  0x44   : > { %p911_p9 = pnand %p909_p7, %p897_p0  ;;  %p917_p5 = scmp.lt.s32.totalorder %s915_s5, %s908_s19 }
  0x46   : > { %p912_p3 = pneg %p911_p9  ;;  %p918_p4 = por %p917_p5, %p916_p13 }
  0x48   : > { %p919_p8 = pnand %p918_p4, %p912_p3 }
  0x4a   : > { %922 = shalt.err (!%p919_p8)
}
  0x4b   : > { %792 = dma.hbm_to_vmem [thread:$0]  (!%p1138_p11), %s1136_s18, 128, %s270_s20, %s259_s22  }
  0x4c   : > { %p1290_p10 = scmp.ne.s32.totalorder %s1283_s9, 0 }
  0x4d   : > { %s1159_s29 = sand.u32 (!%p1290_p10), 1, %s983_s25   ;;  %p1291_p4 = scmp.ne.s32.totalorder (!%p1290_p10), %s1281_s30, 0 }
  0x4e   : > { %278 = sbr.rel (%p1290_p10) target bundleno = 800 (0x320), region = 48  ;;  %s654_s10 = sshll.u32 (!%p1290_p10), %s1159_s29, 3 }
  0x4f   : > { %s281_s3 = scalar_lea.sflag (!%p1290_p10), [#allocation3], %s1159_s29  ;;  %s284_s5 = scalar_lea.vmem (!%p1290_p10), [#allocation2], %s654_s10 }
  0x53   : > { %966 = dma.done.wait (%p1291_p4), %s281_s3, 128  }
  0x54   : > { %968 = vsyncadd (%p1291_p4), %s281_s3, 4294967168  ;;  %p1292_p8 = scmp.eq.s32.totalorder %s1062_s28, 0 }
  0x56   : > { %970 = dma.done.wait (%p1292_p8), [#allocation6], 4096   ;;  %p1293_p3 = pmov %p1292_p8 }
  0x57   : > { %v323_v0 = vld [vmem:[%s284_s5] sm:$0xff]  ;;  %v998_v2 = vmov 0.0   ;;  %v368_v4 = vld [vmem:[#allocation5 + $0x68] sm:$0xff]  ;;  %v367_v5 = vld [vmem:[#allocation5 + $0x60] sm:$0xff]  ;;  %v328_v6 = vlaneseq  ;;  %vm999_vm1 = vmmov 0   ;;  %s663_s17 = sshll.u32 %s1062_s28, 7 }
  0x58   : > { %972 = vsyncadd (%p1293_p3), [#allocation6], 4294963200  ;;  %324 = vadd.xlane.f32.xlu0 %v323_v0  ;;  %v370_v1 = vld [vmem:[#allocation5 + $0x78] sm:$0xff]  ;;  %700 = vmatprep.subr.mxu0 %v998_v2  ;;  %v369_v3 = vld [vmem:[#allocation5 + $0x70] sm:$0xff]  ;;  %s322_s15 = scalar_lea.vmem [#allocation8], %s654_s10  ;;  %s1230_s5 = scalar_lea.hbm %s1274_s7, %s663_s17 }
  0x59   : > { %735 = vmatprep.subr.mxu1 %v998_v2  ;;  %701 = vmatpush3.msra.mxu0 %v370_v1  ;;  %v329_v7 = vand.u32 127, %v328_v6  ;;  %v366_v13 = vld [vmem:[#allocation5 + $0x58] sm:$0xff]  ;;  %v365_v14 = vld [vmem:[#allocation5 + $0x50] sm:$0xff]  ;;  %v364_v15 = vld [vmem:[#allocation5 + $0x48] sm:$0xff]  ;;  %s557_s19 = sshll.u32 %s322_s15, 4  ;;  %s544_s30 = scalar_lea.sflag [#allocation4], %s1159_s29  ;;  %s558_s19 = int_to_ptr.vmem [resolvable:$true] %s557_s19 }
  0x5a   : > { %702 = vmatprep.subr.mxu0 %v998_v2  ;;  %v363_v16 = vld [vmem:[#allocation5 + $0x40] sm:$0xff]  ;;  %732 = vmatprep.mubr.msk.f32.mxu0 %vm999_vm1, %v998_v2  ;;  %v362_v17 = vld [vmem:[#allocation5 + $0x38] sm:$0xff]  ;;  %v361_v18 = vld [vmem:[#allocation5 + $0x30] sm:$0xff]  ;;  %s923_s9 = scalar_lea.vmem %s558_s19, 128  ;;  %p1294_p0 = scmp.ne.s32.totalorder %s1288_s11, 0 }
  0x5b   : > { %703 = vmatpush3.msra.mxu0 %v369_v3  ;;  %vm330_vm0 = vcmp.lt.s32.totalorder %v329_v7, 32  ;;  %767 = vmatprep.mubr.msk.f32.mxu1 %vm999_vm1, %v998_v2  ;;  %v360_v19 = vld [vmem:[#allocation5 + $0x28] sm:$0xff]  ;;  %v359_v20 = vld [vmem:[#allocation5 + $0x20] sm:$0xff]  ;;  %v358_v21 = vld [vmem:[#allocation5 + $0x18] sm:$0xff]  ;;  %p924_p11 = scmp.ne.s32.totalorder %s558_s19, %s923_s9  ;;  %s1000_s28 = smov [#allocation8]  }
  0x5c   : > { %704 = vmatprep.subr.mxu0 %v998_v2  ;;  %v357_v22 = vld [vmem:[#allocation5 + $0x10] sm:$0xff]  ;;  %v356_v23 = vld [vmem:[#allocation5 + $0x8] sm:$0xff]  ;;  %v355_v24 = vld [vmem:[#allocation5] sm:$0xff]  ;;  %s927_s18 = sshll.u32 %s1000_s28, 4  ;;  %s928_s18 = int_to_ptr.vmem [resolvable:$false] %s927_s18 }
  0x5d   : > { %705 = vmatpush3.msra.mxu0 %v368_v4  ;;  %v464_v25 = vld [vmem:[#allocation7 + $0x78] sm:$0xff]  ;;  %v463_v26 = vld [vmem:[#allocation7 + $0x70] sm:$0xff]  ;;  %v462_v27 = vld [vmem:[#allocation7 + $0x68] sm:$0xff]  ;;  %p925_p1 = pnand %p924_p11, %p1294_p0  ;;  %s929_s10 = scalar_lea.vmem %s928_s18, 256 }
  0x5e   : > { %706 = vmatprep.subr.mxu0 %v998_v2  ;;  %736 = vmatpush3.msra.mxu1 %v464_v25  ;;  %v461_v28 = vld [vmem:[#allocation7 + $0x60] sm:$0xff]  ;;  %v460_v29 = vld [vmem:[#allocation7 + $0x58] sm:$0xff]  ;;  %v459_v30 = vld [vmem:[#allocation7 + $0x50] sm:$0xff]  ;;  %p930_p6 = scmp.lt.s32.totalorder %s558_s19, %s928_s18  ;;  %p931_p12 = scmp.lt.s32.totalorder %s929_s10, %s923_s9 }
  0x5f   : > { %707 = vmatpush3.msra.mxu0 %v367_v5  ;;  %737 = vmatprep.subr.mxu1 %v998_v2  ;;  %v458_v31 = vld [vmem:[#allocation7 + $0x48] sm:$0xff]  ;;  %v457_v32 = vld [vmem:[#allocation7 + $0x40] sm:$0xff]  ;;  %v456_v33 = vld [vmem:[#allocation7 + $0x38] sm:$0xff]  ;;  %p926_p2 = pneg %p925_p1 }
  0x60   : > { %708 = vmatprep.subr.mxu0 %v998_v2  ;;  %738 = vmatpush3.msra.mxu1 %v463_v26  ;;  %v455_v34 = vld [vmem:[#allocation7 + $0x30] sm:$0xff]  ;;  %v454_v35 = vld [vmem:[#allocation7 + $0x28] sm:$0xff]  ;;  %v453_v36 = vld [vmem:[#allocation7 + $0x20] sm:$0xff]  ;;  %p932_p7 = por %p931_p12, %p930_p6 }
  0x61   : > { %709 = vmatpush3.msra.mxu0 %v366_v13  ;;  %739 = vmatprep.subr.mxu1 %v998_v2  ;;  %v452_v37 = vld [vmem:[#allocation7 + $0x18] sm:$0xff]  ;;  %v658_v42 = vld [vmem:[%s1268_s1] ss:$0 sm:$0xff]  ;;  %v450_v48 = vld [vmem:[#allocation7 + $0x8] sm:$0xff] }
  0x62   : > { %710 = vmatprep.subr.mxu0 %v998_v2  ;;  %740 = vmatpush3.msra.mxu1 %v462_v27  ;;  %v659_v44 = vld [vmem:[%s1269_s2] ss:$0 sm:$0xff]  ;;  %v449_v49 = vld [vmem:[#allocation7] sm:$0xff]  ;;  %p933_p9 = pnand %p932_p7, %p926_p2 }
  0x63   : > { %711 = vmatpush3.msra.mxu0 %v365_v14  ;;  %741 = vmatprep.subr.mxu1 %v998_v2  ;;  %v451_v47 = vld [vmem:[#allocation7 + $0x10] sm:$0xff] }
  0x64   : > { %712 = vmatprep.subr.mxu0 %v998_v2  ;;  %742 = vmatpush3.msra.mxu1 %v461_v28  ;;  %v660_v50 = vld [vmem:[%s1271_s4] ss:$0 sm:$0xff] }
  0x65   : > { %713 = vmatpush3.msra.mxu0 %v364_v15  ;;  %743 = vmatprep.subr.mxu1 %v998_v2  ;;  %v661_v55 = vld [vmem:[%s1273_s6] ss:$0 sm:$0xff] }
  0x66   : > { %714 = vmatprep.subr.mxu0 %v998_v2  ;;  %744 = vmatpush3.msra.mxu1 %v460_v29 }
  0x67   : > { %715 = vmatpush3.msra.mxu0 %v363_v16  ;;  %745 = vmatprep.subr.mxu1 %v998_v2 }
  0x68   : > { %716 = vmatprep.subr.mxu0 %v998_v2  ;;  %746 = vmatpush3.msra.mxu1 %v459_v30 }
  0x69   : > { %717 = vmatpush3.msra.mxu0 %v362_v17  ;;  %747 = vmatprep.subr.mxu1 %v998_v2 }
  0x6a   : > { %718 = vmatprep.subr.mxu0 %v998_v2  ;;  %748 = vmatpush3.msra.mxu1 %v458_v31 }
  0x6b   : > { %719 = vmatpush3.msra.mxu0 %v361_v18  ;;  %749 = vmatprep.subr.mxu1 %v998_v2 }
  0x6c   : > { %720 = vmatprep.subr.mxu0 %v998_v2  ;;  %750 = vmatpush3.msra.mxu1 %v457_v32 }
  0x6d   : > { %721 = vmatpush3.msra.mxu0 %v360_v19  ;;  %751 = vmatprep.subr.mxu1 %v998_v2 }
  0x6e   : > { %722 = vmatprep.subr.mxu0 %v998_v2  ;;  %752 = vmatpush3.msra.mxu1 %v456_v33 }
  0x6f   : > { %723 = vmatpush3.msra.mxu0 %v359_v20  ;;  %753 = vmatprep.subr.mxu1 %v998_v2 }
  0x70   : > { %724 = vmatprep.subr.mxu0 %v998_v2  ;;  %754 = vmatpush3.msra.mxu1 %v455_v34 }
  0x71   : > { %725 = vmatpush3.msra.mxu0 %v358_v21  ;;  %755 = vmatprep.subr.mxu1 %v998_v2 }
  0x72   : > { %726 = vmatprep.subr.mxu0 %v998_v2  ;;  %756 = vmatpush3.msra.mxu1 %v454_v35 }
  0x73   : > { %727 = vmatpush3.msra.mxu0 %v357_v22  ;;  %757 = vmatprep.subr.mxu1 %v998_v2 }
  0x74   : > { %728 = vmatprep.subr.mxu0 %v998_v2  ;;  %758 = vmatpush3.msra.mxu1 %v453_v36 }
  0x75   : > { %729 = vmatpush3.msra.mxu0 %v356_v23  ;;  %759 = vmatprep.subr.mxu1 %v998_v2 }
  0x76   : > { %730 = vmatprep.subr.mxu0 %v998_v2  ;;  %760 = vmatpush3.msra.mxu1 %v452_v37 }
  0x77   : > { %731 = vmatpush3.msra.mxu0 %v355_v24  ;;  %761 = vmatprep.subr.mxu1 %v998_v2 }
  0x78   : > { %762 = vmatpush3.msra.mxu1 %v451_v47 }
  0x79   : > { %763 = vmatprep.subr.mxu1 %v998_v2 }
  0x7a   : > { %764 = vmatpush3.msra.mxu1 %v450_v48 }
  0x7b   : > { %765 = vmatprep.subr.mxu1 %v998_v2 }
  0x7c   : > { %766 = vmatpush3.msra.mxu1 %v449_v49 }
  0xe1   : > { %v325_v8 = vpop.xlane.xlu0 %324 }
  0xe2   : > { %v326_v9 = vmul.f32 0.03125, %v325_v8 }
  0xe4   : > { %v327_v10 = vsub.f32 %v323_v0, %v326_v9 }
  0xe6   : > { %v1179_v11 = vsel %vm330_vm0, %v327_v10, 0.0 }
  0xe7   : > { %v332_v12 = vmul.f32 %v1179_v11, %v1179_v11 }
  0xe9   : > { %333 = vadd.xlane.f32.xlu0 %v332_v12 }
 0x172   : > { %v334_v38 = vpop.xlane.xlu0 %333 }
 0x173   : > { %v335_v39 = vmul.f32 0.03125, %v334_v38 }
 0x175   : > { %v336_v40 = vadd.f32 1e-05, %v335_v39 }
 0x177   : > { %841 = vrsqrt.f32 %v336_v40 }
 0x184   : > { %v842_v41 = vpop.eup %841 }
 0x185   : > { %v338_v43 = vmul.f32 %v842_v41, %v1179_v11 }
 0x187   : > { %v346_v45 = vmul.f32 %v658_v42, %v338_v43 }
 0x189   : > { %v354_v46 = vadd.f32 %v659_v44, %v346_v45 }
 0x18b   : > { %733 = vmatmul.mubr.f32.vlgmr.msra.gmra.mxu0 %v354_v46 }
 0x24b   : > { %v444_v51 = vpop.f32.mrf.mxu0 }
 0x24c   : > { %v445_v52 = vadd.f32 %v660_v50, %v444_v51 }
 0x24d   : > { %v734_v53 = vpop.f32.mrf.mxu0 }
 0x24e   : > { %v448_v54 = vmax.f32 %v445_v52, 0.0 }
 0x250   : > { %768 = vmatmul.mubr.f32.vlgmr.msra.gmra.mxu1 %v448_v54 }
 0x310   : > { %v538_v56 = vpop.f32.mrf.mxu1 }
 0x311   : > { %v539_v57 = vadd.f32 %v661_v55, %v538_v56 }
 0x312   : > { %v769_v58 = vpop.f32.mrf.mxu1 }
 0x313   : > { %542 = vst [vmem:[%s322_s15] sm:$0xff] %v539_v57 }
 0x314   : > { %936 = shalt.err (!%p933_p9)
}
 0x315   : > { %s937_s20 = scalar_lea.hbm %s1230_s5, 128  ;;  %s941_s22 = scalar_lea.hbm %s1274_s7, 256 }
 0x316   : > { %p938_p13 = scmp.ne.s32.totalorder %s1230_s5, %s937_s20  ;;  %p942_p4 = scmp.lt.s32.totalorder %s1230_s5, %s1274_s7 }
 0x317   : > { %p943_p8 = scmp.lt.s32.totalorder %s941_s22, %s937_s20 }
 0x318   : > { %p939_p5 = pnand %p938_p13, %p1294_p0 }
 0x319   : > { %p944_p3 = por %p943_p8, %p942_p4 }
 0x31a   : > { %p940_p10 = pneg %p939_p5 }
 0x31c   : > { %p945_p11 = pnand %p944_p3, %p940_p10 }
 0x31e   : > { %948 = shalt.err (!%p945_p11)
}
 0x31f   : > { %780 = dma.vmem_to_hbm [thread:$0]  (%p1294_p0), %s558_s19, 128, %s1230_s5, %s544_s30  }
 0x320 PF: > { %s569_s17 = sand.u32 1, %s979_s24   ;;  %p1295_p1 = scmp.ne.s32.totalorder %s1282_s8, 0 }
 0x321   : > { %p1296_p2 = scmp.ge.s32.totalorder %s991_s27, 2  ;;  %s570_s15 = scalar_lea.sflag [#allocation4], %s569_s17 }
 0x323   : > { %p794_p6 = pnand %p1296_p2, %p1295_p1 }
 0x325   : > { %p795_p12 = pneg %p794_p6 }
 0x327   : > { %974 = dma.done.wait (%p795_p12), %s570_s15, 128  }
 0x328   : > { %976 = vsyncadd (%p795_p12), %s570_s15, 4294967168  ;;  %p21_p7 = scmp.ge.s32.totalorder %s1113_s23, 4   ;;  %s1297_s24 = smov %s983_s25 }
 0x329   : > { %s1298_s25 = smov %s987_s26  ;;  %s1299_s26 = smov %s1129_s12 }
 0x32a   : > { %s1300_s27 = smov %s1113_s23  ;;  %23 = sbr.rel (!%p21_p7) target bundleno = 9 (0x9), region = 101 }
 0x32f   :  { %575 = vsyncpa [#allocation3], 1 }
 0x330   :  { %577 = vsyncpa [#allocation3 + $0x1], 1 }
 0x331   :  { %578 = vsyncpa [#allocation6], 1 }
 0x332   :  { %579 = vsyncpa [#allocation4], 1 }
 0x333   :  { %581 = vsyncpa [#allocation4 + $0x1], 1 }

</bundles_post_ra>
